<compile_context>
chip_gen: v5e
topology: v5e:2x2
jax: 0.10.0
libtpu: 0.0.40
codegen_flags: <defaults>
</compile_context>

<pallas_src>
import functools

import jax
import jax.numpy as jnp
from jax.experimental import pallas as pl
from jax.experimental.pallas import tpu as pltpu


def _round_up(x, m):
    return (x + m - 1) // m * m


_vmem_spec = functools.partial(pl.BlockSpec, memory_space=pltpu.MemorySpace.VMEM)


# ----------------------------- fused fast kernel ------------------------------

def _gcn_fused_kernel(x_ref, apa_ref, w_ref, out_ref, *, n_pad, b_pad, f_pad, h_pad):
    f32 = jnp.float32
    cdt = x_ref.dtype                         # compute dtype of the MXU operands

    x = x_ref[...]                            # (n_pad, f_pad)
    a = apa_ref[0:n_pad, :]                   # (n_pad, n_pad)  D^-1/2 (A+I) D^-1/2
    pa = apa_ref[n_pad:n_pad + b_pad, :]      # (b_pad, n_pad)  pool @ A_hat

    w1 = w_ref[0:f_pad, :]                    # (f_pad, h_pad)
    w2 = w_ref[f_pad:f_pad + h_pad, :]        # (h_pad, h_pad)
    w3 = w_ref[f_pad + h_pad:f_pad + 2 * h_pad, :]
    boff = f_pad + 2 * h_pad
    bias = w_ref[boff:boff + 8, :].astype(f32)  # rows 0..2: b1, b2, b3 (+ -1e30 pad)
    b1, b2, b3 = bias[0:1, :], bias[1:2, :], bias[2:3, :]

    # conv1: A @ (X @ W1) + b1 ; relu          (accumulate in f32)
    xw = jnp.dot(x, w1, preferred_element_type=f32)
    h = jnp.dot(a, xw.astype(cdt), preferred_element_type=f32) + b1
    h1 = jnp.maximum(h, 0.0)

    # conv2 ; relu
    hw = jnp.dot(h1.astype(cdt), w2, preferred_element_type=f32)
    h2 = jnp.dot(a, hw.astype(cdt), preferred_element_type=f32) + b2
    h3 = jnp.maximum(h2, 0.0)

    # conv3 fused with global_mean_pool:
    #   pool @ (A @ (h3 W3) + b3) == (pool @ A) @ (h3 W3) + b3   (pool rows sum to 1)
    hw3 = jnp.dot(h3.astype(cdt), w3, preferred_element_type=f32)
    h5 = jnp.dot(pa, hw3.astype(cdt), preferred_element_type=f32) + b3

    # F.dropout(h5, p=0.5, training=False) -> identity at inference.
    # TODO(synk): training-mode dropout would use pltpu.prng_seed/prng_random_bits.

    # F.softmax over dim=1. Pad lanes carry -1e30 (baked into b3) -> exp underflows
    # to 0, so no in-kernel masking is needed.
    m = jnp.max(h5, axis=-1, keepdims=True)
    e = jnp.exp(h5 - m)
    s = jnp.sum(e, axis=-1, keepdims=True)
    inv = pl.reciprocal(s, approx=True)       # EUP slot
    inv = inv * (2.0 - s * inv)               # one Newton step -> calibrated probs
    out_ref[...] = (e * inv).astype(out_ref.dtype)


def make_gcn_forward(a_hat, params, pool, *, compute_dtype=jnp.float32):
    """One-time prep (padding, slab packing, PA = pool @ A_hat); returns jitted forward(x).

    compute_dtype=jnp.bfloat16 halves HBM/VMEM bytes of A_hat / PA / weights
    (recommended on v6e/v7x at realistic N); accumulation and elementwise math
    stay f32 inside the kernel.
    """
    f32 = jnp.float32
    n = a_hat.shape[0]
    f_in, h_dim = params["w1"].shape
    b = pool.shape[0]

    n_pad = _round_up(n, 128)      # lane-dense A / PA / x-row dims
    f_pad = _round_up(f_in, 128)   # lane-dense x feature dim
    h_pad = _round_up(h_dim, 128)  # lane-dense hidden dim (and the output store)
    b_pad = _round_up(b, 8)        # sublane-aligned graph dim

    # --- one packed weight/bias slab: [w1 | w2 | w3 | biases] -------------------
    w_rows = f_pad + 2 * h_pad + 8
    slab = jnp.zeros((w_rows, h_pad), f32)
    slab = slab.at[:f_in, :h_dim].set(params["w1"].astype(f32))
    slab = slab.at[f_pad:f_pad + h_dim, :h_dim].set(params["w2"].astype(f32))
    slab = slab.at[f_pad + h_pad:f_pad + h_pad + h_dim, :h_dim].set(params["w3"].astype(f32))
    boff = f_pad + 2 * h_pad
    slab = slab.at[boff + 0, :h_dim].set(params["b1"].reshape(-1).astype(f32))
    slab = slab.at[boff + 1, :h_dim].set(params["b2"].reshape(-1).astype(f32))
    # b3 row: valid cols get the bias, pad cols get -1e30 so softmax pad lanes -> 0.
    b3_row = jnp.full((h_pad,), -1e30, f32).at[:h_dim].set(params["b3"].reshape(-1).astype(f32))
    slab = slab.at[boff + 2, :].set(b3_row)
    w_slab = slab.astype(compute_dtype)

    # --- one packed A / PA slab: [A_hat (padded) | pool @ A_hat (padded)] -------
    pa = pool.astype(f32) @ a_hat.astype(f32)          # fold global_mean_pool into conv3
    apa = jnp.zeros((n_pad + b_pad, n_pad), f32)
    apa = apa.at[:n, :n].set(a_hat.astype(f32))
    apa = apa.at[n_pad:n_pad + b, :n].set(pa)
    apa_slab = apa.astype(compute_dtype)

    grid_call = pl.pallas_call(
        functools.partial(_gcn_fused_kernel,
                          n_pad=n_pad, b_pad=b_pad, f_pad=f_pad, h_pad=h_pad),
        out_shape=jax.ShapeDtypeStruct((b_pad, h_pad), f32),
        in_specs=[_vmem_spec() for _ in range(3)],
        out_specs=_vmem_spec(),
    )

    @jax.jit
    def forward(x):
        xp = jnp.pad(x.astype(compute_dtype), ((0, n_pad - n), (0, f_pad - f_in)))
        out_pad = grid_call(xp, apa_slab, w_slab)
        return out_pad[:b, :h_dim]

    return forward


# ----------------------- debug kernel (intermediates) -------------------------

def _gcn_debug_kernel(a_ref, x_ref, w1_ref, b1_ref, w2_ref, b2_ref,
                      w3_ref, b3_ref, p_ref,
                      out_ref, h_ref, h1_ref, h2_ref, h3_ref, h4_ref, h5_ref):
    f32 = jnp.float32
    a = a_ref[...]
    x = x_ref[...]

    h = jnp.dot(a, jnp.dot(x, w1_ref[...], preferred_element_type=f32),
                preferred_element_type=f32) + b1_ref[...]
    h_ref[...] = h
    h1 = jnp.maximum(h, 0.0)
    h1_ref[...] = h1

    h2 = jnp.dot(a, jnp.dot(h1, w2_ref[...], preferred_element_type=f32),
                 preferred_element_type=f32) + b2_ref[...]
    h2_ref[...] = h2
    h3 = jnp.maximum(h2, 0.0)
    h3_ref[...] = h3

    h4 = jnp.dot(a, jnp.dot(h3, w3_ref[...], preferred_element_type=f32),
                 preferred_element_type=f32) + b3_ref[...]
    h4_ref[...] = h4

    h5 = jnp.dot(p_ref[...], h4, preferred_element_type=f32)
    h5_ref[...] = h5

    h6 = h5                                 # dropout identity in eval mode
    m = jnp.max(h6, axis=-1, keepdims=True)
    e = jnp.exp(h6 - m)
    s = jnp.sum(e, axis=-1, keepdims=True)
    out_ref[...] = e / s


def gcn_forward_debug(a_hat, x, params, pool):
    """Unfused path that also returns the PyTorch debug intermediates [h..h6]."""
    # TODO(synk): pad these intermediate outputs' last dim to 128 (lane-dense vst)
    # if the debug path's speed ever matters; it is correctness-only today.
    n, _ = x.shape
    h_dim = params["w1"].shape[1]
    b = pool.shape[0]
    f32 = jnp.float32
    out_shapes = (
        jax.ShapeDtypeStruct((b, h_dim), f32),   # out (softmax)
        jax.ShapeDtypeStruct((n, h_dim), f32),   # h
        jax.ShapeDtypeStruct((n, h_dim), f32),   # h1
        jax.ShapeDtypeStruct((n, h_dim), f32),   # h2
        jax.ShapeDtypeStruct((n, h_dim), f32),   # h3
        jax.ShapeDtypeStruct((n, h_dim), f32),   # h4
        jax.ShapeDtypeStruct((b, h_dim), f32),   # h5
    )
    out, h, h1, h2, h3, h4, h5 = pl.pallas_call(
        _gcn_debug_kernel,
        out_shape=out_shapes,
        in_specs=[_vmem_spec() for _ in range(9)],
        out_specs=tuple(_vmem_spec() for _ in range(7)),
    )(a_hat, x, params["w1"], params["b1"], params["w2"], params["b2"],
      params["w3"], params["b3"], pool)
    h6 = h5                                      # F.dropout eval-mode identity
    return out, [h, h1, h2, h3, h4, h5, h6]


# ------------------------------ plain-JAX glue --------------------------------

def build_norm_adj(edge_index, num_nodes):
    """Dense D^-1/2 (A + I) D^-1/2, matching torch_geometric GCNConv's gcn_norm."""
    src, dst = edge_index[0], edge_index[1]
    a = jnp.zeros((num_nodes, num_nodes), jnp.float32)
    a = a.at[dst, src].add(1.0)                       # scatter-ADD (duplicates accumulate)
    a = a + jnp.eye(num_nodes, dtype=jnp.float32)     # add self loops
    deg = a.sum(axis=1)
    dinv = jnp.where(deg > 0, 1.0 / jnp.sqrt(deg), 0.0)
    return dinv[:, None] * a * dinv[None, :]


def build_pool(batch, num_graphs):
    """(B, N) matrix implementing global_mean_pool."""
    onehot = (batch[None, :] == jnp.arange(num_graphs)[:, None]).astype(jnp.float32)
    counts = onehot.sum(axis=1, keepdims=True)
    return onehot / jnp.maximum(counts, 1.0)


def gcn_reference(a_hat, x, params, pool):
    """Pure-JAX reference of the PyTorch forward (for validation only)."""
    h = a_hat @ (x @ params["w1"]) + params["b1"]
    h1 = jnp.maximum(h, 0.0)
    h2 = a_hat @ (h1 @ params["w2"]) + params["b2"]
    h3 = jnp.maximum(h2, 0.0)
    h4 = a_hat @ (h3 @ params["w3"]) + params["b3"]
    h5 = pool @ h4
    h6 = h5
    return jax.nn.softmax(h6, axis=-1)


if __name__ == "__main__":
    N, F_IN, H, NUM_CLASSES, B = 16, 4, 32, 3, 2

    key = jax.random.PRNGKey(0)
    k = jax.random.split(key, 8)

    # node features
    x = jax.random.normal(k[0], (N, F_IN), jnp.float32)

    # two graphs: nodes 0..7 -> graph 0, nodes 8..15 -> graph 1 (chain edges,
    # stored in both directions, PyG style)
    src = jnp.array([0, 1, 2, 3, 4, 5, 6, 8, 9, 10, 11, 12, 13, 14], jnp.int32)
    dst = jnp.array([1, 2, 3, 4, 5, 6, 7, 9, 10, 11, 12, 13, 14, 15], jnp.int32)
    edge_index = jnp.stack([jnp.concatenate([src, dst]),
                            jnp.concatenate([dst, src])])
    batch = jnp.concatenate([jnp.zeros(8, jnp.int32), jnp.ones(8, jnp.int32)])

    def glorot(kk, shape):
        fan_in, fan_out = shape
        lim = (6.0 / (fan_in + fan_out)) ** 0.5
        return jax.random.uniform(kk, shape, jnp.float32, -lim, lim)

    params = {
        # GCNConv weights: glorot, biases: zeros (PyG default)
        "w1": glorot(k[1], (F_IN, H)), "b1": jnp.zeros((1, H), jnp.float32),
        "w2": glorot(k[2], (H, H)),    "b2": jnp.zeros((1, H), jnp.float32),
        "w3": glorot(k[3], (H, H)),    "b3": jnp.zeros((1, H), jnp.float32),
        # self.lin is created in __init__ but never applied in forward()
        "w_lin": glorot(k[4], (H, NUM_CLASSES)),
        "b_lin": jnp.zeros((NUM_CLASSES,), jnp.float32),
    }

    a_hat = build_norm_adj(edge_index, N)
    pool = build_pool(batch, B)
    ref = gcn_reference(a_hat, x, params, pool)

    # Fast fused kernel: one-time prep, then a jitted pad->kernel->slice forward.
    gcn_fwd = make_gcn_forward(a_hat, params, pool)          # f32 operands
    out = gcn_fwd(x)
    jax.block_until_ready(out)
    assert out.shape == (B, H)
    assert jnp.allclose(out, ref, rtol=5e-4, atol=5e-4)
    assert jnp.allclose(out.sum(axis=-1), 1.0, atol=1e-3)

    # bf16 operand variant (v6e/v7x: half the HBM/VMEM bytes for A_hat/weights;
    # f32 accumulation/elementwise inside the kernel).
    gcn_fwd_bf16 = make_gcn_forward(a_hat, params, pool, compute_dtype=jnp.bfloat16)
    out_bf16 = gcn_fwd_bf16(x)
    jax.block_until_ready(out_bf16)
    assert out_bf16.shape == (B, H)
    assert jnp.allclose(out_bf16, ref, atol=5e-2)            # bf16 operand quantization
    assert jnp.allclose(out_bf16.sum(axis=-1), 1.0, atol=5e-3)

    # Debug path with the PyTorch intermediates [h, h1, h2, h3, h4, h5, h6].
    out_dbg, inters = gcn_forward_debug(a_hat, x, params, pool)
    jax.block_until_ready(out_dbg)
    assert jnp.allclose(out_dbg, ref, rtol=5e-4, atol=5e-4)
    assert len(inters) == 7

    print("KERNEL_OK")
</pallas_src>

<mosaic_0001>
module attributes {stable_mosaic.version = 11 : i64} {
  func.func @_gcn_fused_kernel(%arg0: memref<128x128xf32, #tpu.memory_space<vmem>>, %arg1: memref<136x128xf32, #tpu.memory_space<vmem>>, %arg2: memref<392x128xf32, #tpu.memory_space<vmem>>, %arg3: memref<8x128xf32, #tpu.memory_space<vmem>>) attributes {dimension_semantics = [], scalar_prefetch = 0 : i64, scratch_operands = 0 : i64, tpu.core_type = #tpu.core_type<tc>} {
    %c0 = arith.constant 0 : index
    %c0_0 = arith.constant 0 : index
    %0 = vector.load %arg0[%c0, %c0_0] : memref<128x128xf32, #tpu.memory_space<vmem>>, vector<128x128xf32>
    %c0_1 = arith.constant 0 : index
    %c0_2 = arith.constant 0 : index
    %1 = vector.load %arg1[%c0_1, %c0_2] : memref<136x128xf32, #tpu.memory_space<vmem>>, vector<128x128xf32>
    %c128 = arith.constant 128 : index
    %c0_3 = arith.constant 0 : index
    %2 = vector.load %arg1[%c128, %c0_3] : memref<136x128xf32, #tpu.memory_space<vmem>>, vector<8x128xf32>
    %c0_4 = arith.constant 0 : index
    %c0_5 = arith.constant 0 : index
    %3 = vector.load %arg2[%c0_4, %c0_5] : memref<392x128xf32, #tpu.memory_space<vmem>>, vector<128x128xf32>
    %c128_6 = arith.constant 128 : index
    %c0_7 = arith.constant 0 : index
    %4 = vector.load %arg2[%c128_6, %c0_7] : memref<392x128xf32, #tpu.memory_space<vmem>>, vector<128x128xf32>
    %c256 = arith.constant 256 : index
    %c0_8 = arith.constant 0 : index
    %5 = vector.load %arg2[%c256, %c0_8] : memref<392x128xf32, #tpu.memory_space<vmem>>, vector<128x128xf32>
    %c384 = arith.constant 384 : index
    %c0_9 = arith.constant 0 : index
    %6 = vector.load %arg2[%c384, %c0_9] : memref<392x128xf32, #tpu.memory_space<vmem>>, vector<8x128xf32>
    %7 = vector.extract_strided_slice %6 {offsets = [0, 0], sizes = [1, 128], strides = [1, 1]} : vector<8x128xf32> to vector<1x128xf32>
    %8 = vector.extract_strided_slice %6 {offsets = [1, 0], sizes = [1, 128], strides = [1, 1]} : vector<8x128xf32> to vector<1x128xf32>
    %9 = vector.extract_strided_slice %6 {offsets = [2, 0], sizes = [1, 128], strides = [1, 1]} : vector<8x128xf32> to vector<1x128xf32>
    %cst = arith.constant dense<0.000000e+00> : vector<128x128xf32>
    %10 = tpu.matmul %0, %3, %cst {dimension_numbers = #tpu.dot_dimension_numbers<[1], [0], [0], [1], [0, 0, 1, 1], [], []>} : vector<128x128xf32>, vector<128x128xf32>, vector<128x128xf32> -> vector<128x128xf32>
    %cst_10 = arith.constant dense<0.000000e+00> : vector<128x128xf32>
    %11 = tpu.matmul %1, %10, %cst_10 {dimension_numbers = #tpu.dot_dimension_numbers<[1], [0], [0], [1], [0, 0, 1, 1], [], []>} : vector<128x128xf32>, vector<128x128xf32>, vector<128x128xf32> -> vector<128x128xf32>
    %12 = vector.broadcast %7 : vector<1x128xf32> to vector<128x128xf32>
    %13 = arith.addf %11, %12 : vector<128x128xf32>
    %cst_11 = arith.constant 0.000000e+00 : f32
    %14 = vector.broadcast %cst_11 : f32 to vector<128x128xf32>
    %15 = arith.maximumf %13, %14 : vector<128x128xf32>
    %cst_12 = arith.constant dense<0.000000e+00> : vector<128x128xf32>
    %16 = tpu.matmul %15, %4, %cst_12 {dimension_numbers = #tpu.dot_dimension_numbers<[1], [0], [0], [1], [0, 0, 1, 1], [], []>} : vector<128x128xf32>, vector<128x128xf32>, vector<128x128xf32> -> vector<128x128xf32>
    %cst_13 = arith.constant dense<0.000000e+00> : vector<128x128xf32>
    %17 = tpu.matmul %1, %16, %cst_13 {dimension_numbers = #tpu.dot_dimension_numbers<[1], [0], [0], [1], [0, 0, 1, 1], [], []>} : vector<128x128xf32>, vector<128x128xf32>, vector<128x128xf32> -> vector<128x128xf32>
    %18 = vector.broadcast %8 : vector<1x128xf32> to vector<128x128xf32>
    %19 = arith.addf %17, %18 : vector<128x128xf32>
    %cst_14 = arith.constant 0.000000e+00 : f32
    %20 = vector.broadcast %cst_14 : f32 to vector<128x128xf32>
    %21 = arith.maximumf %19, %20 : vector<128x128xf32>
    %cst_15 = arith.constant dense<0.000000e+00> : vector<128x128xf32>
    %22 = tpu.matmul %21, %5, %cst_15 {dimension_numbers = #tpu.dot_dimension_numbers<[1], [0], [0], [1], [0, 0, 1, 1], [], []>} : vector<128x128xf32>, vector<128x128xf32>, vector<128x128xf32> -> vector<128x128xf32>
    %cst_16 = arith.constant dense<0.000000e+00> : vector<8x128xf32>
    %23 = tpu.matmul %2, %22, %cst_16 {dimension_numbers = #tpu.dot_dimension_numbers<[1], [0], [0], [1], [0, 0, 1, 1], [], []>} : vector<8x128xf32>, vector<128x128xf32>, vector<8x128xf32> -> vector<8x128xf32>
    %24 = vector.broadcast %9 : vector<1x128xf32> to vector<8x128xf32>
    %25 = arith.addf %23, %24 : vector<8x128xf32>
    %cst_17 = arith.constant dense<0xFF800000> : vector<8xf32>
    %26 = vector.multi_reduction <maximumf>, %25, %cst_17 [1] : vector<8x128xf32> to vector<8xf32>
    %27 = vector.shape_cast %26 : vector<8xf32> to vector<8x1xf32>
    %28 = vector.broadcast %27 : vector<8x1xf32> to vector<8x128xf32>
    %29 = arith.subf %25, %28 : vector<8x128xf32>
    %30 = math.exp %29 : vector<8x128xf32>
    %cst_18 = arith.constant dense<0.000000e+00> : vector<8xf32>
    %31 = vector.multi_reduction <add>, %30, %cst_18 [1] : vector<8x128xf32> to vector<8xf32>
    %32 = vector.shape_cast %31 : vector<8xf32> to vector<8x1xf32>
    %33 = tpu.reciprocal %32 {approx = true} : vector<8x1xf32> -> vector<8x1xf32>
    %34 = arith.mulf %32, %33 : vector<8x1xf32>
    %cst_19 = arith.constant 2.000000e+00 : f32
    %35 = vector.broadcast %cst_19 : f32 to vector<8x1xf32>
    %36 = arith.subf %35, %34 : vector<8x1xf32>
    %37 = arith.mulf %33, %36 : vector<8x1xf32>
    %38 = vector.broadcast %37 : vector<8x1xf32> to vector<8x128xf32>
    %39 = arith.mulf %30, %38 : vector<8x128xf32>
    %c0_20 = arith.constant 0 : index
    %c0_21 = arith.constant 0 : index
    %40 = vector.load %arg3[%c0_20, %c0_21] : memref<8x128xf32, #tpu.memory_space<vmem>>, vector<8x128xf32>
    tpu.vector_store %arg3[%c0_20, %c0_21], %39 {strides = array<i32>} : memref<8x128xf32, #tpu.memory_space<vmem>>, vector<8x128xf32>,
    return
  }
}

</mosaic_0001>

<bundles_post_ra>
// kernel: forward.1
= control target key start
LH: loop header
LB: loop body
LE: loop exit
PB: predicated region body
PF: predicated region fallthrough
CT: control target
= control target key end

     0   :  { %8 = vsyncpa [#allocation3], 0  ;;  %s591_s15 = smov [#allocation2]   ;;  %s592_s17 = smov 128   ;;  %s788_s0 = inlined_call_operand.vmem [shape: f32[128,128], index: 0, kind: input, shape index: {}]   ;;  %s789_s1 = inlined_call_operand.vmem [shape: f32[136,128], index: 1, kind: input, shape index: {}]   ;;  %s790_s2 = inlined_call_operand.hbm [shape: f32[392,128], index: 2, kind: input, shape index: {}]   ;;  %s791_s3 = inlined_call_operand.vmem [shape: f32[8,128], index: 3, kind: output, shape index: {}]  }
   0x1   :  { %s17_s14 = sshll.u32 %s790_s2, 4  ;;  %s19_s16 = sshll.u32 %s591_s15, 4  ;;  %s18_s14 = int_to_ptr.hbm [resolvable:$true] %s17_s14  ;;  %s20_s16 = int_to_ptr.vmem [resolvable:$true] %s19_s16 }
   0x2   :  { %s593_s18 = smov 8  }
   0x3   :  { %25 = dma.hbm_to_vmem [thread:$0]  %s18_s14, 6272, %s20_s16, [#allocation3], %s592_s17, %s592_s17, %s593_s18  }
   0x4   :  { %589 = dma.done.wait [#allocation3], 6272  }
   0x5   :  { %590 = vsyncadd [#allocation3], 4294961024  ;;  %v78_v0 = vld [vmem:[#allocation2 + $0x78] sm:$0xff]  ;;  %v77_v1 = vld [vmem:[#allocation2 + $0x70] sm:$0xff] }
   0x6   :  { %511 = vmatpush.msra.mxu2 %v78_v0  ;;  %512 = vmatpush.msra.mxu3 %v78_v0  ;;  %v76_v2 = vld [vmem:[#allocation2 + $0x68] sm:$0xff]  ;;  %v75_v3 = vld [vmem:[#allocation2 + $0x60] sm:$0xff]  ;;  %v74_v4 = vld [vmem:[#allocation2 + $0x58] sm:$0xff] }
   0x7   :  { %112 = vmatpush.msra.mxu0 %v78_v0  ;;  %510 = vmatpush.msra.mxu1 %v78_v0  ;;  %v73_v5 = vld [vmem:[#allocation2 + $0x50] sm:$0xff]  ;;  %v72_v6 = vld [vmem:[#allocation2 + $0x48] sm:$0xff]  ;;  %v71_v7 = vld [vmem:[#allocation2 + $0x40] sm:$0xff] }
   0x8   :  { %514 = vmatpush.msra.mxu2 %v77_v1  ;;  %515 = vmatpush.msra.mxu3 %v77_v1  ;;  %v70_v8 = vld [vmem:[#allocation2 + $0x38] sm:$0xff]  ;;  %v69_v9 = vld [vmem:[#allocation2 + $0x30] sm:$0xff]  ;;  %v68_v10 = vld [vmem:[#allocation2 + $0x28] sm:$0xff] }
   0x9   :  { %113 = vmatpush.msra.mxu0 %v77_v1  ;;  %513 = vmatpush.msra.mxu1 %v77_v1  ;;  %v67_v11 = vld [vmem:[#allocation2 + $0x20] sm:$0xff]  ;;  %v66_v12 = vld [vmem:[#allocation2 + $0x18] sm:$0xff]  ;;  %v65_v13 = vld [vmem:[#allocation2 + $0x10] sm:$0xff] }
   0xa   :  { %517 = vmatpush.msra.mxu2 %v76_v2  ;;  %518 = vmatpush.msra.mxu3 %v76_v2  ;;  %v64_v14 = vld [vmem:[#allocation2 + $0x8] sm:$0xff]  ;;  %v63_v15 = vld [vmem:[#allocation2] sm:$0xff]  ;;  %v37_v16 = vld [vmem:[%s788_s0 + $0x38] sm:$0xff] }
   0xb   :  { %114 = vmatpush.msra.mxu0 %v76_v2  ;;  %516 = vmatpush.msra.mxu1 %v76_v2  ;;  %v42_v17 = vld [vmem:[%s788_s0 + $0x60] sm:$0xff]  ;;  %v35_v19 = vld [vmem:[%s788_s0 + $0x28] sm:$0xff]  ;;  %v36_v23 = vld [vmem:[%s788_s0 + $0x30] sm:$0xff] }
   0xc   :  { %520 = vmatpush.msra.mxu2 %v75_v3  ;;  %521 = vmatpush.msra.mxu3 %v75_v3  ;;  %v30_v18 = vld [vmem:[%s788_s0] sm:$0xff]  ;;  %v43_v21 = vld [vmem:[%s788_s0 + $0x68] sm:$0xff]  ;;  %v44_v25 = vld [vmem:[%s788_s0 + $0x70] sm:$0xff] }
   0xd   :  { %115 = vmatpush.msra.mxu0 %v75_v3  ;;  %519 = vmatpush.msra.mxu1 %v75_v3  ;;  %v38_v20 = vld [vmem:[%s788_s0 + $0x40] sm:$0xff]  ;;  %v31_v22 = vld [vmem:[%s788_s0 + $0x8] sm:$0xff]  ;;  %v32_v26 = vld [vmem:[%s788_s0 + $0x10] sm:$0xff] }
   0xe   :  { %523 = vmatpush.msra.mxu2 %v74_v4  ;;  %524 = vmatpush.msra.mxu3 %v74_v4  ;;  %v39_v24 = vld [vmem:[%s788_s0 + $0x48] sm:$0xff]  ;;  %v40_v27 = vld [vmem:[%s788_s0 + $0x50] sm:$0xff]  ;;  %v45_v28 = vld [vmem:[%s788_s0 + $0x78] sm:$0xff] }
   0xf   :  { %116 = vmatpush.msra.mxu0 %v74_v4  ;;  %522 = vmatpush.msra.mxu1 %v74_v4  ;;  %v33_v29 = vld [vmem:[%s788_s0 + $0x18] sm:$0xff]  ;;  %v34_v31 = vld [vmem:[%s788_s0 + $0x20] sm:$0xff]  ;;  %v674_v49 = vld [vmem:[%s789_s1 + $0x8] sm:$0xff] }
  0x10   :  { %526 = vmatpush.msra.mxu2 %v73_v5  ;;  %527 = vmatpush.msra.mxu3 %v73_v5  ;;  %v41_v30 = vld [vmem:[%s788_s0 + $0x58] sm:$0xff]  ;;  %v668_v48 = vld [vmem:[%s789_s1] sm:$0xff]  ;;  %v680_v50 = vld [vmem:[%s789_s1 + $0x10] sm:$0xff] }
  0x11   :  { %117 = vmatpush.msra.mxu0 %v73_v5  ;;  %525 = vmatpush.msra.mxu1 %v73_v5  ;;  %v686_v51 = vld [vmem:[%s789_s1 + $0x18] sm:$0xff]  ;;  %v692_v52 = vld [vmem:[%s789_s1 + $0x20] sm:$0xff]  ;;  %v698_v53 = vld [vmem:[%s789_s1 + $0x28] sm:$0xff] }
  0x12   :  { %529 = vmatpush.msra.mxu2 %v72_v6  ;;  %530 = vmatpush.msra.mxu3 %v72_v6  ;;  %v704_v54 = vld [vmem:[%s789_s1 + $0x30] sm:$0xff]  ;;  %v710_v55 = vld [vmem:[%s789_s1 + $0x38] sm:$0xff]  ;;  %v716_v56 = vld [vmem:[%s789_s1 + $0x40] sm:$0xff] }
  0x13   :  { %118 = vmatpush.msra.mxu0 %v72_v6  ;;  %528 = vmatpush.msra.mxu1 %v72_v6  ;;  %v94_v57 = vld [vmem:[#allocation2 + $0xf8] sm:$0xff]  ;;  %v93_v58 = vld [vmem:[#allocation2 + $0xf0] sm:$0xff]  ;;  %v92_v59 = vld [vmem:[#allocation2 + $0xe8] sm:$0xff] }
  0x14   :  { %532 = vmatpush.msra.mxu2 %v71_v7  ;;  %533 = vmatpush.msra.mxu3 %v71_v7  ;;  %v722_v60 = vld [vmem:[%s789_s1 + $0x48] sm:$0xff]  ;;  %v91_v61 = vld [vmem:[#allocation2 + $0xe0] sm:$0xff]  ;;  %v90_v62 = vld [vmem:[#allocation2 + $0xd8] sm:$0xff] }
  0x15   :  { %119 = vmatpush.msra.mxu0 %v71_v7  ;;  %531 = vmatpush.msra.mxu1 %v71_v7  ;;  %v89_v63 = vld [vmem:[#allocation2 + $0xd0] sm:$0xff]  ;;  %v88_v0 = vld [vmem:[#allocation2 + $0xc8] sm:$0xff]  ;;  %v87_v2 = vld [vmem:[#allocation2 + $0xc0] sm:$0xff] }
  0x16   :  { %535 = vmatpush.msra.mxu2 %v70_v8  ;;  %536 = vmatpush.msra.mxu3 %v70_v8  ;;  %v728_v1 = vld [vmem:[%s789_s1 + $0x50] sm:$0xff]  ;;  %v86_v3 = vld [vmem:[#allocation2 + $0xb8] sm:$0xff]  ;;  %v84_v5 = vld [vmem:[#allocation2 + $0xa8] sm:$0xff] }
  0x17   :  { %120 = vmatpush.msra.mxu0 %v70_v8  ;;  %534 = vmatpush.msra.mxu1 %v70_v8  ;;  %v85_v4 = vld [vmem:[#allocation2 + $0xb0] sm:$0xff]  ;;  %v734_v6 = vld [vmem:[%s789_s1 + $0x58] sm:$0xff]  ;;  %v83_v7 = vld [vmem:[#allocation2 + $0xa0] sm:$0xff] }
  0x18   :  { %538 = vmatpush.msra.mxu2 %v69_v9  ;;  %539 = vmatpush.msra.mxu3 %v69_v9  ;;  %v82_v8 = vld [vmem:[#allocation2 + $0x98] sm:$0xff] }
  0x19   :  { %121 = vmatpush.msra.mxu0 %v69_v9  ;;  %537 = vmatpush.msra.mxu1 %v69_v9  ;;  %v81_v9 = vld [vmem:[#allocation2 + $0x90] sm:$0xff] }
  0x1a   :  { %541 = vmatpush.msra.mxu2 %v68_v10  ;;  %542 = vmatpush.msra.mxu3 %v68_v10 }
  0x1b   :  { %122 = vmatpush.msra.mxu0 %v68_v10  ;;  %540 = vmatpush.msra.mxu1 %v68_v10  ;;  %v740_v10 = vld [vmem:[%s789_s1 + $0x60] sm:$0xff] }
  0x1c   :  { %544 = vmatpush.msra.mxu2 %v67_v11  ;;  %545 = vmatpush.msra.mxu3 %v67_v11 }
  0x1d   :  { %123 = vmatpush.msra.mxu0 %v67_v11  ;;  %543 = vmatpush.msra.mxu1 %v67_v11  ;;  %v80_v11 = vld [vmem:[#allocation2 + $0x88] sm:$0xff] }
  0x1e   :  { %547 = vmatpush.msra.mxu2 %v66_v12  ;;  %548 = vmatpush.msra.mxu3 %v66_v12 }
  0x1f   :  { %124 = vmatpush.msra.mxu0 %v66_v12  ;;  %546 = vmatpush.msra.mxu1 %v66_v12  ;;  %v79_v12 = vld [vmem:[#allocation2 + $0x80] sm:$0xff] }
  0x20   :  { %550 = vmatpush.msra.mxu2 %v65_v13  ;;  %551 = vmatpush.msra.mxu3 %v65_v13 }
  0x21   :  { %125 = vmatpush.msra.mxu0 %v65_v13  ;;  %549 = vmatpush.msra.mxu1 %v65_v13  ;;  %v746_v13 = vld [vmem:[%s789_s1 + $0x68] sm:$0xff] }
  0x22   :  { %553 = vmatpush.msra.mxu2 %v64_v14  ;;  %554 = vmatpush.msra.mxu3 %v64_v14 }
  0x23   :  { %126 = vmatpush.msra.mxu0 %v64_v14  ;;  %552 = vmatpush.msra.mxu1 %v64_v14  ;;  %v752_v14 = vld [vmem:[%s789_s1 + $0x70] sm:$0xff] }
  0x24   :  { %556 = vmatpush.msra.mxu2 %v63_v15  ;;  %557 = vmatpush.msra.mxu3 %v63_v15 }
  0x25   :  { %149 = vmatmul.f32.vlgmr.msra.gmra.mxu2 %v37_v16  ;;  %164 = vmatmul.f32.vlgmr.msra.gmra.mxu3 %v42_v17  ;;  %v760_v16 = vld [vmem:[#allocation2 + $0x180] sm:$0xff] }
  0x26   :  { %127 = vmatpush.msra.mxu0 %v63_v15  ;;  %555 = vmatpush.msra.mxu1 %v63_v15  ;;  %v758_v15 = vld [vmem:[%s789_s1 + $0x78] sm:$0xff]  ;;  %v177_v17 = vperm.slane %v760_v16, 0 }
  0x27   :  { %128 = vmatmul.f32.vlgmr.msra.gmra.mxu0 %v30_v18  ;;  %143 = vmatmul.f32.vlgmr.msra.gmra.mxu1 %v35_v19 }
  0x28   :  { %259 = vmatpush.msrb.mxu2 %v94_v57 }
  0x2a   :  { %260 = vmatpush.msrb.mxu2 %v93_v58 }
  0x2c   :  { %261 = vmatpush.msrb.mxu2 %v92_v59 }
  0x2d   :  { %152 = vmatmul.f32.gmra.mxu2 %v38_v20  ;;  %167 = vmatmul.f32.gmra.mxu3 %v43_v21 }
  0x2e   :  { %262 = vmatpush.msrb.mxu2 %v91_v61 }
  0x2f   :  { %131 = vmatmul.f32.gmra.mxu0 %v31_v22  ;;  %146 = vmatmul.f32.gmra.mxu1 %v36_v23 }
  0x30   :  { %263 = vmatpush.msrb.mxu2 %v90_v62 }
  0x32   :  { %264 = vmatpush.msrb.mxu2 %v89_v63 }
  0x34   :  { %265 = vmatpush.msrb.mxu2 %v88_v0 }
  0x35   :  { %155 = vmatmul.f32.gmra.mxu2 %v39_v24  ;;  %170 = vmatmul.f32.gmra.mxu3 %v44_v25 }
  0x36   :  { %266 = vmatpush.msrb.mxu2 %v87_v2 }
  0x37   :  { %134 = vmatmul.f32.gmra.mxu0 %v32_v26 }
  0x38   :  { %267 = vmatpush.msrb.mxu2 %v86_v3 }
  0x3a   :  { %268 = vmatpush.msrb.mxu2 %v85_v4 }
  0x3c   :  { %269 = vmatpush.msrb.mxu2 %v84_v5 }
  0x3d   :  { %158 = vmatmul.f32.gmra.mxu2 %v40_v27  ;;  %173 = vmatmul.f32.gmra.mxu3 %v45_v28 }
  0x3e   :  { %270 = vmatpush.msrb.mxu2 %v83_v7 }
  0x3f   :  { %137 = vmatmul.f32.gmra.mxu0 %v33_v29 }
  0x40   :  { %271 = vmatpush.msrb.mxu2 %v82_v8 }
  0x42   :  { %272 = vmatpush.msrb.mxu2 %v81_v9 }
  0x44   :  { %273 = vmatpush.msrb.mxu2 %v80_v11 }
  0x45   :  { %161 = vmatmul.f32.gmra.mxu2 %v41_v30 }
  0x46   :  { %274 = vmatpush.msrb.mxu2 %v79_v12 }
  0x47   :  { %140 = vmatmul.f32.gmra.mxu0 %v34_v31 }
  0xa4   :  { %v129_v34 = vpop.f32.mrf.mxu0  ;;  %v144_v43 = vpop.f32.mrf.mxu1 }
  0xa8   :  { %v150_v32 = vpop.f32.mrf.mxu2  ;;  %v165_v33 = vpop.f32.mrf.mxu3 }
  0xac   :  { %v132_v37 = vpop.f32.mrf.mxu0  ;;  %v147_v46 = vpop.f32.mrf.mxu1 }
  0xb0   :  { %v153_v35 = vpop.f32.mrf.mxu2  ;;  %v168_v36 = vpop.f32.mrf.mxu3 }
  0xb4   :  { %v135_v40 = vpop.f32.mrf.mxu0 }
  0xb8   :  { %v156_v38 = vpop.f32.mrf.mxu2  ;;  %v171_v39 = vpop.f32.mrf.mxu3 }
  0xbc   :  { %v138_v45 = vpop.f32.mrf.mxu0 }
  0xc0   :  { %v159_v41 = vpop.f32.mrf.mxu2  ;;  %v174_v42 = vpop.f32.mrf.mxu3 }
  0xc1   :  { %178 = vmatpush.msrb.mxu1 %v174_v42 }
  0xc3   :  { %179 = vmatpush.msrb.mxu1 %v171_v39 }
  0xc4   :  { %v141_v47 = vpop.f32.mrf.mxu0 }
  0xc5   :  { %180 = vmatpush.msrb.mxu1 %v168_v36 }
  0xc7   :  { %181 = vmatpush.msrb.mxu1 %v165_v33 }
  0xc8   :  { %v162_v44 = vpop.f32.mrf.mxu2 }
  0xc9   :  { %182 = vmatpush.msrb.mxu1 %v162_v44 }
  0xcb   :  { %183 = vmatpush.msrb.mxu1 %v159_v41 }
  0xcd   :  { %184 = vmatpush.msrb.mxu1 %v156_v38 }
  0xcf   :  { %185 = vmatpush.msrb.mxu1 %v153_v35 }
  0xd1   :  { %186 = vmatpush.msrb.mxu1 %v150_v32 }
  0xd3   :  { %187 = vmatpush.msrb.mxu1 %v147_v46 }
  0xd5   :  { %188 = vmatpush.msrb.mxu1 %v144_v43 }
  0xd7   :  { %189 = vmatpush.msrb.mxu1 %v141_v47 }
  0xd9   :  { %190 = vmatpush.msrb.mxu1 %v138_v45 }
  0xdb   :  { %191 = vmatpush.msrb.mxu1 %v135_v40 }
  0xdd   :  { %192 = vmatpush.msrb.mxu1 %v132_v37 }
  0xdf   :  { %193 = vmatpush.msrb.mxu1 %v129_v34 }
  0xe0   :  { %194 = vmatmul.f32.vlgmr.msrb.gmra.mxu1 %v668_v48 }
  0xe8   :  { %197 = vmatmul.f32.gmra.mxu1 %v674_v49 }
  0xf0   :  { %200 = vmatmul.f32.gmra.mxu1 %v680_v50 }
  0xf8   :  { %203 = vmatmul.f32.gmra.mxu1 %v686_v51 }
 0x100   :  { %206 = vmatmul.f32.gmra.mxu1 %v692_v52 }
 0x108   :  { %209 = vmatmul.f32.gmra.mxu1 %v698_v53 }
 0x110   :  { %212 = vmatmul.f32.gmra.mxu1 %v704_v54 }
 0x118   :  { %215 = vmatmul.f32.gmra.mxu1 %v710_v55 }
 0x120   :  { %218 = vmatmul.f32.gmra.mxu1 %v716_v56 }
 0x128   :  { %221 = vmatmul.f32.gmra.mxu1 %v722_v60 }
 0x130   :  { %224 = vmatmul.f32.gmra.mxu1 %v728_v1 }
 0x138   :  { %227 = vmatmul.f32.gmra.mxu1 %v734_v6 }
 0x140   :  { %230 = vmatmul.f32.gmra.mxu1 %v740_v10 }
 0x148   :  { %233 = vmatmul.f32.gmra.mxu1 %v746_v13 }
 0x150   :  { %236 = vmatmul.f32.gmra.mxu1 %v752_v14 }
 0x158   :  { %239 = vmatmul.f32.gmra.mxu1 %v758_v15 }
 0x15d   :  { %v195_v18 = vpop.f32.mrf.mxu1 }
 0x15e   :  { %v196_v19 = vadd.f32 %v195_v18, %v177_v17 }
 0x160   :  { %v243_v20 = vmax.f32 %v196_v19, 0.0 }
 0x162   :  { %275 = vmatmul.f32.vlgmr.msrb.gmra.mxu2 %v243_v20 }
 0x165   :  { %v198_v21 = vpop.f32.mrf.mxu1 }
 0x166   :  { %v199_v22 = vadd.f32 %v198_v21, %v177_v17 }
 0x168   :  { %v244_v23 = vmax.f32 %v199_v22, 0.0 }
 0x16a   :  { %278 = vmatmul.f32.gmra.mxu2 %v244_v23 }
 0x16d   :  { %v201_v24 = vpop.f32.mrf.mxu1 }
 0x16e   :  { %v202_v25 = vadd.f32 %v201_v24, %v177_v17 }
 0x170   :  { %v245_v26 = vmax.f32 %v202_v25, 0.0 }
 0x172   :  { %281 = vmatmul.f32.gmra.mxu2 %v245_v26 }
 0x175   :  { %v204_v27 = vpop.f32.mrf.mxu1 }
 0x176   :  { %v205_v28 = vadd.f32 %v204_v27, %v177_v17 }
 0x178   :  { %v246_v29 = vmax.f32 %v205_v28, 0.0 }
 0x17a   :  { %284 = vmatmul.f32.gmra.mxu2 %v246_v29 }
 0x17d   :  { %v207_v30 = vpop.f32.mrf.mxu1 }
 0x17e   :  { %v208_v31 = vadd.f32 %v207_v30, %v177_v17 }
 0x180   :  { %v247_v32 = vmax.f32 %v208_v31, 0.0 }
 0x182   :  { %287 = vmatmul.f32.gmra.mxu2 %v247_v32 }
 0x185   :  { %v210_v33 = vpop.f32.mrf.mxu1 }
 0x186   :  { %v211_v34 = vadd.f32 %v210_v33, %v177_v17 }
 0x188   :  { %v248_v35 = vmax.f32 %v211_v34, 0.0 }
 0x18a   :  { %290 = vmatmul.f32.gmra.mxu2 %v248_v35 }
 0x18d   :  { %v213_v36 = vpop.f32.mrf.mxu1 }
 0x18e   :  { %v214_v37 = vadd.f32 %v213_v36, %v177_v17  ;;  %v99_v36 = vld [vmem:[#allocation2 + $0x120] sm:$0xff] }
 0x190   :  { %v249_v38 = vmax.f32 %v214_v37, 0.0  ;;  %v98_v37 = vld [vmem:[#allocation2 + $0x118] sm:$0xff] }
 0x192   :  { %293 = vmatmul.f32.gmra.mxu2 %v249_v38  ;;  %v96_v38 = vld [vmem:[#allocation2 + $0x108] sm:$0xff] }
 0x195   :  { %v216_v39 = vpop.f32.mrf.mxu1 }
 0x196   :  { %v217_v40 = vadd.f32 %v216_v39, %v177_v17  ;;  %v95_v39 = vld [vmem:[#allocation2 + $0x100] sm:$0xff] }
 0x198   :  { %v250_v41 = vmax.f32 %v217_v40, 0.0 }
 0x19a   :  { %296 = vmatmul.f32.gmra.mxu2 %v250_v41 }
 0x19d   :  { %v219_v42 = vpop.f32.mrf.mxu1 }
 0x19e   :  { %v220_v43 = vadd.f32 %v219_v42, %v177_v17 }
 0x1a0   :  { %v251_v44 = vmax.f32 %v220_v43, 0.0 }
 0x1a2   :  { %299 = vmatmul.f32.gmra.mxu2 %v251_v44 }
 0x1a5   :  { %v222_v45 = vpop.f32.mrf.mxu1 }
 0x1a6   :  { %v223_v46 = vadd.f32 %v222_v45, %v177_v17 }
 0x1a8   :  { %v252_v47 = vmax.f32 %v223_v46, 0.0 }
 0x1aa   :  { %302 = vmatmul.f32.gmra.mxu2 %v252_v47 }
 0x1ad   :  { %v225_v57 = vpop.f32.mrf.mxu1 }
 0x1ae   :  { %v226_v58 = vadd.f32 %v225_v57, %v177_v17 }
 0x1b0   :  { %v253_v59 = vmax.f32 %v226_v58, 0.0 }
 0x1b2   :  { %305 = vmatmul.f32.gmra.mxu2 %v253_v59 }
 0x1b5   :  { %v228_v61 = vpop.f32.mrf.mxu1 }
 0x1b6   :  { %v229_v62 = vadd.f32 %v228_v61, %v177_v17 }
 0x1b8   :  { %v254_v63 = vmax.f32 %v229_v62, 0.0 }
 0x1ba   :  { %308 = vmatmul.f32.gmra.mxu2 %v254_v63 }
 0x1bd   :  { %v231_v0 = vpop.f32.mrf.mxu1 }
 0x1be   :  { %v232_v2 = vadd.f32 %v231_v0, %v177_v17 }
 0x1c0   :  { %v255_v3 = vmax.f32 %v232_v2, 0.0 }
 0x1c2   :  { %311 = vmatmul.f32.gmra.mxu2 %v255_v3 }
 0x1c5   :  { %v234_v4 = vpop.f32.mrf.mxu1 }
 0x1c6   :  { %v235_v5 = vadd.f32 %v234_v4, %v177_v17 }
 0x1c8   :  { %v256_v7 = vmax.f32 %v235_v5, 0.0 }
 0x1ca   :  { %314 = vmatmul.f32.gmra.mxu2 %v256_v7 }
 0x1cd   :  { %v237_v8 = vpop.f32.mrf.mxu1 }
 0x1ce   :  { %v238_v9 = vadd.f32 %v237_v8, %v177_v17 }
 0x1d0   :  { %v257_v11 = vmax.f32 %v238_v9, 0.0 }
 0x1d2   :  { %317 = vmatmul.f32.gmra.mxu2 %v257_v11 }
 0x1d5   :  { %v240_v12 = vpop.f32.mrf.mxu1 }
 0x1d6   :  { %v241_v18 = vadd.f32 %v240_v12, %v177_v17  ;;  %v110_v17 = vld [vmem:[#allocation2 + $0x178] sm:$0xff] }
 0x1d7   :  { %406 = vmatpush.msrb.mxu0 %v110_v17 }
 0x1d8   :  { %v258_v19 = vmax.f32 %v241_v18, 0.0 }
 0x1da   :  { %320 = vmatmul.f32.gmra.mxu2 %v258_v19 }
 0x1e5   :  { %v276_v20 = vpop.f32.mrf.mxu2 }
 0x1ed   :  { %v279_v21 = vpop.f32.mrf.mxu2 }
 0x1f5   :  { %v282_v22 = vpop.f32.mrf.mxu2 }
 0x1fd   :  { %v285_v23 = vpop.f32.mrf.mxu2 }
 0x205   :  { %v288_v24 = vpop.f32.mrf.mxu2 }
 0x20d   :  { %v291_v25 = vpop.f32.mrf.mxu2 }
 0x215   :  { %v294_v26 = vpop.f32.mrf.mxu2 }
 0x21d   :  { %v297_v27 = vpop.f32.mrf.mxu2 }
 0x225   :  { %v300_v28 = vpop.f32.mrf.mxu2 }
 0x22d   :  { %v303_v29 = vpop.f32.mrf.mxu2 }
 0x235   :  { %v306_v30 = vpop.f32.mrf.mxu2 }
 0x23d   :  { %v309_v31 = vpop.f32.mrf.mxu2 }
 0x245   :  { %v312_v32 = vpop.f32.mrf.mxu2 }
 0x24d   :  { %v315_v33 = vpop.f32.mrf.mxu2 }
 0x255   :  { %v318_v34 = vpop.f32.mrf.mxu2 }
 0x25d   :  { %v321_v35 = vpop.f32.mrf.mxu2 }
 0x25e   :  { %325 = vmatpush.msrb.mxu3 %v321_v35 }
 0x260   :  { %326 = vmatpush.msrb.mxu3 %v318_v34 }
 0x262   :  { %327 = vmatpush.msrb.mxu3 %v315_v33 }
 0x264   :  { %328 = vmatpush.msrb.mxu3 %v312_v32 }
 0x266   :  { %329 = vmatpush.msrb.mxu3 %v309_v31 }
 0x268   :  { %330 = vmatpush.msrb.mxu3 %v306_v30 }
 0x26a   :  { %331 = vmatpush.msrb.mxu3 %v303_v29 }
 0x26c   :  { %332 = vmatpush.msrb.mxu3 %v300_v28 }
 0x26e   :  { %333 = vmatpush.msrb.mxu3 %v297_v27 }
 0x270   :  { %334 = vmatpush.msrb.mxu3 %v294_v26 }
 0x272   :  { %335 = vmatpush.msrb.mxu3 %v291_v25 }
 0x274   :  { %336 = vmatpush.msrb.mxu3 %v288_v24 }
 0x276   :  { %337 = vmatpush.msrb.mxu3 %v285_v23 }
 0x278   :  { %338 = vmatpush.msrb.mxu3 %v282_v22 }
 0x27a   :  { %339 = vmatpush.msrb.mxu3 %v279_v21 }
 0x27c   :  { %340 = vmatpush.msrb.mxu3 %v276_v20 }
 0x27d   :  { %341 = vmatmul.f32.vlgmr.msrb.gmra.mxu3 %v668_v48  ;;  %v109_v48 = vld [vmem:[#allocation2 + $0x170] sm:$0xff] }
 0x27e   :  { %407 = vmatpush.msrb.mxu0 %v109_v48 }
 0x285   :  { %344 = vmatmul.f32.gmra.mxu3 %v674_v49  ;;  %v108_v49 = vld [vmem:[#allocation2 + $0x168] sm:$0xff] }
 0x286   :  { %408 = vmatpush.msrb.mxu0 %v108_v49 }
 0x28d   :  { %347 = vmatmul.f32.gmra.mxu3 %v680_v50  ;;  %v107_v50 = vld [vmem:[#allocation2 + $0x160] sm:$0xff] }
 0x28e   :  { %409 = vmatpush.msrb.mxu0 %v107_v50 }
 0x295   :  { %350 = vmatmul.f32.gmra.mxu3 %v686_v51  ;;  %v106_v51 = vld [vmem:[#allocation2 + $0x158] sm:$0xff] }
 0x296   :  { %410 = vmatpush.msrb.mxu0 %v106_v51 }
 0x29d   :  { %353 = vmatmul.f32.gmra.mxu3 %v692_v52  ;;  %v105_v52 = vld [vmem:[#allocation2 + $0x150] sm:$0xff] }
 0x29e   :  { %411 = vmatpush.msrb.mxu0 %v105_v52 }
 0x2a5   :  { %356 = vmatmul.f32.gmra.mxu3 %v698_v53  ;;  %v104_v53 = vld [vmem:[#allocation2 + $0x148] sm:$0xff] }
 0x2a6   :  { %412 = vmatpush.msrb.mxu0 %v104_v53 }
 0x2ad   :  { %359 = vmatmul.f32.gmra.mxu3 %v704_v54  ;;  %v103_v54 = vld [vmem:[#allocation2 + $0x140] sm:$0xff] }
 0x2ae   :  { %413 = vmatpush.msrb.mxu0 %v103_v54 }
 0x2b5   :  { %362 = vmatmul.f32.gmra.mxu3 %v710_v55  ;;  %v102_v55 = vld [vmem:[#allocation2 + $0x138] sm:$0xff] }
 0x2b6   :  { %414 = vmatpush.msrb.mxu0 %v102_v55 }
 0x2bd   :  { %365 = vmatmul.f32.gmra.mxu3 %v716_v56  ;;  %v101_v56 = vld [vmem:[#allocation2 + $0x130] sm:$0xff] }
 0x2be   :  { %415 = vmatpush.msrb.mxu0 %v101_v56 }
 0x2c5   :  { %368 = vmatmul.f32.gmra.mxu3 %v722_v60  ;;  %v100_v60 = vld [vmem:[#allocation2 + $0x128] sm:$0xff] }
 0x2c6   :  { %416 = vmatpush.msrb.mxu0 %v100_v60 }
 0x2c8   :  { %417 = vmatpush.msrb.mxu0 %v99_v36 }
 0x2ca   :  { %418 = vmatpush.msrb.mxu0 %v98_v37 }
 0x2cd   :  { %371 = vmatmul.f32.gmra.mxu3 %v728_v1  ;;  %v97_v1 = vld [vmem:[#allocation2 + $0x110] sm:$0xff] }
 0x2ce   :  { %419 = vmatpush.msrb.mxu0 %v97_v1 }
 0x2d0   :  { %420 = vmatpush.msrb.mxu0 %v96_v38 }
 0x2d2   :  { %421 = vmatpush.msrb.mxu0 %v95_v39 }
 0x2d5   :  { %374 = vmatmul.f32.gmra.mxu3 %v734_v6  ;;  %v324_v6 = vperm.slane %v760_v16, 1 }
 0x2dd   :  { %377 = vmatmul.f32.gmra.mxu3 %v740_v10 }
 0x2e5   :  { %380 = vmatmul.f32.gmra.mxu3 %v746_v13 }
 0x2ed   :  { %383 = vmatmul.f32.gmra.mxu3 %v752_v14 }
 0x2f5   :  { %386 = vmatmul.f32.gmra.mxu3 %v758_v15 }
 0x300   :  { %v342_v40 = vpop.f32.mrf.mxu3 }
 0x301   :  { %v343_v41 = vadd.f32 %v342_v40, %v324_v6 }
 0x303   :  { %v390_v42 = vmax.f32 %v343_v41, 0.0 }
 0x305   :  { %422 = vmatmul.f32.vlgmr.msrb.gmra.mxu0 %v390_v42  ;;  %v471_v42 = vperm.slane %v760_v16, 2 }
 0x308   :  { %v345_v10 = vpop.f32.mrf.mxu3 }
 0x309   :  { %v346_v43 = vadd.f32 %v345_v10, %v324_v6 }
 0x30b   :  { %v391_v44 = vmax.f32 %v346_v43, 0.0 }
 0x30d   :  { %425 = vmatmul.f32.gmra.mxu0 %v391_v44 }
 0x310   :  { %v348_v45 = vpop.f32.mrf.mxu3 }
 0x311   :  { %v349_v46 = vadd.f32 %v348_v45, %v324_v6 }
 0x313   :  { %v392_v47 = vmax.f32 %v349_v46, 0.0 }
 0x315   :  { %428 = vmatmul.f32.gmra.mxu0 %v392_v47 }
 0x318   :  { %v351_v57 = vpop.f32.mrf.mxu3 }
 0x319   :  { %v352_v13 = vadd.f32 %v351_v57, %v324_v6 }
 0x31b   :  { %v393_v58 = vmax.f32 %v352_v13, 0.0 }
 0x31d   :  { %431 = vmatmul.f32.gmra.mxu0 %v393_v58 }
 0x320   :  { %v354_v14 = vpop.f32.mrf.mxu3 }
 0x321   :  { %v355_v15 = vadd.f32 %v354_v14, %v324_v6 }
 0x323   :  { %v394_v59 = vmax.f32 %v355_v15, 0.0 }
 0x325   :  { %434 = vmatmul.f32.gmra.mxu0 %v394_v59 }
 0x328   :  { %v357_v61 = vpop.f32.mrf.mxu3 }
 0x329   :  { %v358_v62 = vadd.f32 %v357_v61, %v324_v6 }
 0x32b   :  { %v395_v63 = vmax.f32 %v358_v62, 0.0 }
 0x32d   :  { %437 = vmatmul.f32.gmra.mxu0 %v395_v63 }
 0x330   :  { %v360_v0 = vpop.f32.mrf.mxu3 }
 0x331   :  { %v361_v2 = vadd.f32 %v360_v0, %v324_v6 }
 0x333   :  { %v396_v3 = vmax.f32 %v361_v2, 0.0 }
 0x335   :  { %440 = vmatmul.f32.gmra.mxu0 %v396_v3 }
 0x338   :  { %v363_v4 = vpop.f32.mrf.mxu3 }
 0x339   :  { %v364_v5 = vadd.f32 %v363_v4, %v324_v6 }
 0x33b   :  { %v397_v7 = vmax.f32 %v364_v5, 0.0 }
 0x33d   :  { %443 = vmatmul.f32.gmra.mxu0 %v397_v7 }
 0x340   :  { %v366_v8 = vpop.f32.mrf.mxu3 }
 0x341   :  { %v367_v9 = vadd.f32 %v366_v8, %v324_v6 }
 0x343   :  { %v398_v11 = vmax.f32 %v367_v9, 0.0 }
 0x345   :  { %446 = vmatmul.f32.gmra.mxu0 %v398_v11 }
 0x348   :  { %v369_v12 = vpop.f32.mrf.mxu3 }
 0x349   :  { %v370_v18 = vadd.f32 %v369_v12, %v324_v6 }
 0x34b   :  { %v399_v19 = vmax.f32 %v370_v18, 0.0 }
 0x34d   :  { %449 = vmatmul.f32.gmra.mxu0 %v399_v19 }
 0x350   :  { %v372_v20 = vpop.f32.mrf.mxu3 }
 0x351   :  { %v373_v21 = vadd.f32 %v372_v20, %v324_v6 }
 0x353   :  { %v400_v22 = vmax.f32 %v373_v21, 0.0 }
 0x355   :  { %452 = vmatmul.f32.gmra.mxu0 %v400_v22 }
 0x358   :  { %v375_v23 = vpop.f32.mrf.mxu3 }
 0x359   :  { %v376_v24 = vadd.f32 %v375_v23, %v324_v6 }
 0x35b   :  { %v401_v25 = vmax.f32 %v376_v24, 0.0 }
 0x35d   :  { %455 = vmatmul.f32.gmra.mxu0 %v401_v25 }
 0x360   :  { %v378_v26 = vpop.f32.mrf.mxu3 }
 0x361   :  { %v379_v27 = vadd.f32 %v378_v26, %v324_v6 }
 0x363   :  { %v402_v28 = vmax.f32 %v379_v27, 0.0 }
 0x365   :  { %458 = vmatmul.f32.gmra.mxu0 %v402_v28 }
 0x368   :  { %v381_v29 = vpop.f32.mrf.mxu3 }
 0x369   :  { %v382_v30 = vadd.f32 %v381_v29, %v324_v6 }
 0x36b   :  { %v403_v31 = vmax.f32 %v382_v30, 0.0 }
 0x36d   :  { %461 = vmatmul.f32.gmra.mxu0 %v403_v31 }
 0x370   :  { %v384_v32 = vpop.f32.mrf.mxu3 }
 0x371   :  { %v385_v33 = vadd.f32 %v384_v32, %v324_v6 }
 0x373   :  { %v404_v34 = vmax.f32 %v385_v33, 0.0 }
 0x375   :  { %464 = vmatmul.f32.gmra.mxu0 %v404_v34 }
 0x378   :  { %v387_v35 = vpop.f32.mrf.mxu3 }
 0x379   :  { %v388_v17 = vadd.f32 %v387_v35, %v324_v6  ;;  %v62_v6 = vld [vmem:[%s789_s1 + $0x80] sm:$0xff] }
 0x37b   :  { %v405_v48 = vmax.f32 %v388_v17, 0.0 }
 0x37d   :  { %467 = vmatmul.f32.gmra.mxu0 %v405_v48 }
 0x382   :  { %v423_v49 = vpop.f32.mrf.mxu0 }
 0x38a   :  { %v426_v50 = vpop.f32.mrf.mxu0 }
 0x392   :  { %v429_v51 = vpop.f32.mrf.mxu0 }
 0x39a   :  { %v432_v52 = vpop.f32.mrf.mxu0 }
 0x3a2   :  { %v435_v53 = vpop.f32.mrf.mxu0 }
 0x3aa   :  { %v438_v54 = vpop.f32.mrf.mxu0 }
 0x3b2   :  { %v441_v55 = vpop.f32.mrf.mxu0 }
 0x3ba   :  { %v444_v56 = vpop.f32.mrf.mxu0 }
 0x3c2   :  { %v447_v60 = vpop.f32.mrf.mxu0 }
 0x3ca   :  { %v450_v36 = vpop.f32.mrf.mxu0 }
 0x3d2   :  { %v453_v37 = vpop.f32.mrf.mxu0 }
 0x3da   :  { %v456_v1 = vpop.f32.mrf.mxu0 }
 0x3e2   :  { %v459_v38 = vpop.f32.mrf.mxu0 }
 0x3ea   :  { %v462_v39 = vpop.f32.mrf.mxu0 }
 0x3f2   :  { %v465_v40 = vpop.f32.mrf.mxu0 }
 0x3fa   :  { %v468_v41 = vpop.f32.mrf.mxu0 }
 0x3fb   :  { %472 = vmatpush.msra.mxu1 %v468_v41 }
 0x3fd   :  { %473 = vmatpush.msra.mxu1 %v465_v40 }
 0x3ff   :  { %474 = vmatpush.msra.mxu1 %v462_v39 }
 0x401   :  { %475 = vmatpush.msra.mxu1 %v459_v38 }
 0x403   :  { %476 = vmatpush.msra.mxu1 %v456_v1 }
 0x405   :  { %477 = vmatpush.msra.mxu1 %v453_v37 }
 0x407   :  { %478 = vmatpush.msra.mxu1 %v450_v36 }
 0x409   :  { %479 = vmatpush.msra.mxu1 %v447_v60 }
 0x40b   :  { %480 = vmatpush.msra.mxu1 %v444_v56 }
 0x40d   :  { %481 = vmatpush.msra.mxu1 %v441_v55 }
 0x40f   :  { %482 = vmatpush.msra.mxu1 %v438_v54 }
 0x411   :  { %483 = vmatpush.msra.mxu1 %v435_v53 }
 0x413   :  { %484 = vmatpush.msra.mxu1 %v432_v52 }
 0x415   :  { %485 = vmatpush.msra.mxu1 %v429_v51 }
 0x417   :  { %486 = vmatpush.msra.mxu1 %v426_v50 }
 0x419   :  { %487 = vmatpush.msra.mxu1 %v423_v49 }
 0x41a   :  { %488 = vmatmul.f32.vlgmr.msra.gmra.mxu1 %v62_v6 }
 0x497   :  { %v489_v10 = vpop.f32.mrf.mxu1 }
 0x498   :  { %v490_v43 = vadd.f32 %v489_v10, %v471_v42 }
 0x49a   :  { %492 = vmax.xlane.f32.xlu0 %v490_v43 }
 0x50d   :  { %v493_v44 = vpop.xlane.xlu0 %492 }
 0x50e   :  { %v494_v45 = vsub.f32 %v490_v43, %v493_v44 }
 0x510   :  { %v495_v46 = vmul.f32 1.442695, %v494_v45 }
 0x512   :  { %561 = vpow2.f32 %v495_v46 }
 0x518   :  { %v562_v47 = vpop.eup %561 }
 0x519   :  { %497 = vadd.xlane.f32.xlu0 %v562_v47 }
 0x58c   :  { %v498_v57 = vpop.xlane.xlu0 %497 }
 0x58d   :  { %563 = vrcp.f32 %v498_v57 }
 0x593   :  { %v564_v13 = vpop.eup %563 }
 0x594   :  { %v500_v58 = vmul.f32 %v564_v13, %v498_v57 }
 0x596   :  { %v501_v14 = vsub.f32 2.0, %v500_v58 }
 0x598   :  { %v502_v15 = vmul.f32 %v564_v13, %v501_v14 }
 0x59a   :  { %v503_v59 = vmul.f32 %v562_v47, %v502_v15 }
 0x59c   :  { %504 = vst [vmem:[%s791_s3] sm:$0xff] %v503_v59 }
 0x59d   :  { %509 = vsyncpa [#allocation3], 1 }

</bundles_post_ra>
